<compile_context>
chip_gen: v5e
topology: v5e:2x2
jax: 0.10.0
libtpu: 0.0.40
codegen_flags: <defaults>
</compile_context>

<pallas_src>
import jax
import jax.numpy as jnp
from jax.experimental import pallas as pl
from jax.experimental.pallas import tpu as pltpu


# -----------------------------------------------------------------------------
# Fused conv (matmul) + InstanceNorm + affine + ReLU + residual / tanh kernel
# -----------------------------------------------------------------------------
def _make_fused_kernel(has_norm, relu, has_res, tanh, eps):
    def kernel(*refs):
        refs = list(refs)
        w_ref = refs.pop(0)          # (Cout, K)   bf16
        c_ref = refs.pop(0)          # (K, M)      bf16  (per-sample, batch squeezed)
        g_ref = b_ref = r_ref = None
        if has_norm:
            g_ref = refs.pop(0)      # (Cout, 1)   f32
            b_ref = refs.pop(0)      # (Cout, 1)   f32
        if has_res:
            r_ref = refs.pop(0)      # (Cout, M)   f32
        o_ref = refs.pop(0)          # (Cout, M)   f32

        # MXU matmul, bf16 operands, f32 accumulation. M (spatial) on lanes.
        y = jnp.dot(w_ref[...], c_ref[...], preferred_element_type=jnp.float32)

        if has_norm:
            # Per-sample, per-channel InstanceNorm (biased variance, like PyTorch).
            mean = jnp.mean(y, axis=1, keepdims=True)
            var = jnp.mean((y - mean) ** 2, axis=1, keepdims=True)
            y = (y - mean) * jax.lax.rsqrt(var + eps)
            y = y * g_ref[...] + b_ref[...]
        if relu:
            y = jnp.maximum(y, 0.0)
        if has_res:
            y = y + r_ref[...]
        if tanh:
            y = jnp.tanh(y)
        o_ref[...] = y

    return kernel


# -----------------------------------------------------------------------------
# im2col glue (NCHW, transposed form: (B, K, M) with K = k*k*Cin, M = Hout*Wout)
# TODO(synk): stream the k*k taps through the Pallas pipeline (grid axis over
#             taps with offset index_maps) instead of materializing patches.
# -----------------------------------------------------------------------------
def _im2col_T(x_nchw, k, stride, pad):
    B, C, H, W = x_nchw.shape
    xp = jnp.pad(x_nchw, ((0, 0), (0, 0), (pad, pad), (pad, pad)))
    Hout = (H + 2 * pad - k) // stride + 1
    Wout = (W + 2 * pad - k) // stride + 1
    taps = []
    for ki in range(k):
        for kj in range(k):
            taps.append(xp[:, :, ki:ki + stride * Hout:stride,
                           kj:kj + stride * Wout:stride])
    cols = jnp.stack(taps, axis=1)                    # (B, k*k, C, Hout, Wout)
    colsT = cols.reshape(B, k * k * C, Hout * Wout)   # K ordered (ki, kj, c)
    return colsT, Hout, Wout


def conv_in_fused(x_nchw, w_oihw, k, stride, pad, *, gamma=None, beta=None,
                  relu=False, residual=None, tanh=False, eps=1e-5):
    """Fused Conv2d (no bias) + optional InstanceNorm/affine/ReLU/residual/tanh.

    x_nchw:   (B, Cin, H, W) f32
    w_oihw:   (Cout, Cin, k, k) PyTorch Conv2d layout
    residual: (B, Cout, Hout, Wout) f32 or None
    returns   (B, Cout, Hout, Wout) f32
    """
    B = x_nchw.shape[0]
    Cout = w_oihw.shape[0]

    colsT, Hout, Wout = _im2col_T(x_nchw.astype(jnp.float32), k, stride, pad)
    K = colsT.shape[1]
    M = Hout * Wout

    # bf16 MXU operands, f32 accumulation inside the kernel.
    colsT = colsT.astype(jnp.bfloat16)
    wT = jnp.transpose(w_oihw, (0, 2, 3, 1)).reshape(Cout, K).astype(jnp.bfloat16)

    has_norm = gamma is not None
    has_res = residual is not None

    args = [wT, colsT]
    in_specs = [
        pl.BlockSpec((Cout, K), lambda b: (0, 0)),          # resident across grid
        pl.BlockSpec((None, K, M), lambda b: (b, 0, 0)),    # per-sample im2col^T
    ]
    if has_norm:
        args += [gamma.reshape(Cout, 1).astype(jnp.float32),
                 beta.reshape(Cout, 1).astype(jnp.float32)]
        in_specs += [pl.BlockSpec((Cout, 1), lambda b: (0, 0)),
                     pl.BlockSpec((Cout, 1), lambda b: (0, 0))]
    if has_res:
        args.append(residual.reshape(B, Cout, M).astype(jnp.float32))
        in_specs.append(pl.BlockSpec((None, Cout, M), lambda b: (b, 0, 0)))

    flops = 2 * B * Cout * K * M
    bytes_accessed = (wT.size * 2 + colsT.size * 2 + B * Cout * M * 4
                      + (B * Cout * M * 4 if has_res else 0)
                      + (2 * Cout * 4 if has_norm else 0))
    transcendentals = B * Cout * M if tanh else 0

    out = pl.pallas_call(
        _make_fused_kernel(has_norm, relu, has_res, tanh, eps),
        out_shape=jax.ShapeDtypeStruct((B, Cout, M), jnp.float32),
        grid=(B,),
        in_specs=in_specs,
        out_specs=pl.BlockSpec((None, Cout, M), lambda b: (b, 0, 0)),
        compiler_params=pltpu.CompilerParams(
            dimension_semantics=("parallel",)),
        cost_estimate=pl.CostEstimate(flops=flops,
                                      transcendentals=transcendentals,
                                      bytes_accessed=bytes_accessed),
    )(*args)
    # TODO(synk): at production resolutions tile the per-sample block over HW
    #             (running sum/sumsq scratch + pl.when finalize) and set
    #             vmem_limit_bytes so the kernel stays VMEM-safe on v7x.
    return out.reshape(B, Cout, Hout, Wout)


def conv_transpose_in_fused(x_nchw, w_iokk, k, stride, pad, *, gamma, beta, relu):
    """ConvTranspose2d (PyTorch weight layout (Cin, Cout, k, k), no bias)
    fused with InstanceNorm + affine + ReLU, via the equivalent forward conv."""
    B, Cin, H, W = x_nchw.shape
    Hd, Wd = (H - 1) * stride + 1, (W - 1) * stride + 1
    xd = jnp.zeros((B, Cin, Hd, Wd), jnp.float32)
    xd = xd.at[:, :, ::stride, ::stride].set(x_nchw.astype(jnp.float32))
    # equivalent forward conv: flip spatially, swap in/out channel axes
    w_eq = jnp.transpose(jnp.flip(w_iokk, axis=(2, 3)), (1, 0, 2, 3))
    # TODO(synk): replace zero-dilation with stride-phase (sub-pixel) convs to
    #             avoid the ~75% zero rows fed to the MXU for stride-2 upsampling.
    return conv_in_fused(xd, w_eq, k, 1, k - 1 - pad,
                         gamma=gamma, beta=beta, relu=relu)


# -----------------------------------------------------------------------------
# Generator parameters + forward
# -----------------------------------------------------------------------------
def init_params(key, conv_dim=16, c_dim=5, repeat_num=2):
    keys = iter(jax.random.split(key, 128))

    def conv_w(shape):
        return 0.05 * jax.random.normal(next(keys), shape, jnp.float32)

    def in_ab(c):
        return jnp.ones((c,), jnp.float32), jnp.zeros((c,), jnp.float32)

    p = {}
    p["conv0_w"] = conv_w((conv_dim, 3 + c_dim, 7, 7))
    p["in0_g"], p["in0_b"] = in_ab(conv_dim)

    curr = conv_dim
    p["down"] = []
    for _ in range(2):
        w = conv_w((curr * 2, curr, 4, 4))
        g, b = in_ab(curr * 2)
        p["down"].append((w, g, b))
        curr *= 2

    p["res"] = []
    for _ in range(repeat_num):
        w1 = conv_w((curr, curr, 3, 3))
        g1, b1 = in_ab(curr)
        w2 = conv_w((curr, curr, 3, 3))
        g2, b2 = in_ab(curr)
        p["res"].append((w1, g1, b1, w2, g2, b2))

    p["up"] = []
    for _ in range(2):
        w = conv_w((curr, curr // 2, 4, 4))   # ConvTranspose2d weight: (Cin, Cout, k, k)
        g, b = in_ab(curr // 2)
        p["up"].append((w, g, b))
        curr //= 2

    p["convf_w"] = conv_w((3, curr, 7, 7))
    return p


def generator_forward(params, x_nchw, c):
    """Matches PyTorch Generator.forward(x, c); x: (B,3,H,W), c: (B,c_dim)."""
    B, _, H, W = x_nchw.shape
    x = x_nchw.astype(jnp.float32)
    cmap = jnp.broadcast_to(c[:, :, None, None].astype(jnp.float32),
                            (B, c.shape[1], H, W))
    x = jnp.concatenate([x, cmap], axis=1)                       # NCHW concat

    # initial 7x7 conv + IN + ReLU (fused)
    x = conv_in_fused(x, params["conv0_w"], 7, 1, 3,
                      gamma=params["in0_g"], beta=params["in0_b"], relu=True)

    # down-sampling
    for (w, g, b) in params["down"]:
        x = conv_in_fused(x, w, 4, 2, 1, gamma=g, beta=b, relu=True)

    # bottleneck residual blocks
    for (w1, g1, b1, w2, g2, b2) in params["res"]:
        skip = x
        h = conv_in_fused(x, w1, 3, 1, 1, gamma=g1, beta=b1, relu=True)
        x = conv_in_fused(h, w2, 3, 1, 1, gamma=g2, beta=b2, relu=False,
                          residual=skip)

    # up-sampling
    for (w, g, b) in params["up"]:
        x = conv_transpose_in_fused(x, w, 4, 2, 1, gamma=g, beta=b, relu=True)

    # final 7x7 conv + tanh (fused)
    x = conv_in_fused(x, params["convf_w"], 7, 1, 3, tanh=True)
    return x                                                     # already NCHW


if __name__ == "__main__":
    key = jax.random.PRNGKey(0)
    kx, kc, kp = jax.random.split(key, 3)

    # small shapes consistent with the module (conv_dim / repeat_num are ctor args)
    B, H, W = 2, 16, 16
    conv_dim, c_dim, repeat_num = 16, 5, 2

    x = jax.random.normal(kx, (B, 3, H, W), jnp.float32)
    c = jax.random.normal(kc, (B, c_dim), jnp.float32)
    params = init_params(kp, conv_dim=conv_dim, c_dim=c_dim, repeat_num=repeat_num)

    y = generator_forward(params, x, c)
    y = jax.block_until_ready(y)
    assert y.shape == (B, 3, H, W), y.shape
    assert bool(jnp.all(jnp.isfinite(y)))
    assert bool(jnp.all(jnp.abs(y) <= 1.0))   # tanh output range
    print("KERNEL_OK")
</pallas_src>

<mosaic_0001>
module attributes {stable_mosaic.version = 11 : i64} {
  func.func @kernel(%arg0: i32, %arg1: memref<16x392xbf16, #tpu.memory_space<vmem>>, %arg2: memref<1x392x256xbf16, #tpu.memory_space<vmem>>, %arg3: memref<16x1xf32, #tpu.memory_space<vmem>>, %arg4: memref<16x1xf32, #tpu.memory_space<vmem>>, %arg5: memref<1x16x256xf32, #tpu.memory_space<vmem>>) attributes {dimension_semantics = [#tpu.dimension_semantics<parallel>], iteration_bounds = array<i64: 2>, scalar_prefetch = 0 : i64, scratch_operands = 0 : i64, tpu.core_type = #tpu.core_type<tc>, window_params = [{pipeline_mode = #tpu.pipeline_mode<synchronous>, transform_indices = @transform_0, window_bounds = array<i64: 16, 392>}, {transform_indices = @transform_1, window_bounds = array<i64: 1, 392, 256>}, {pipeline_mode = #tpu.pipeline_mode<synchronous>, transform_indices = @transform_2, window_bounds = array<i64: 16, 1>}, {pipeline_mode = #tpu.pipeline_mode<synchronous>, transform_indices = @transform_3, window_bounds = array<i64: 16, 1>}, {transform_indices = @transform_4, window_bounds = array<i64: 1, 16, 256>}]} {
    %c0 = arith.constant 0 : index
    %c0_0 = arith.constant 0 : index
    %0 = vector.load %arg1[%c0, %c0_0] : memref<16x392xbf16, #tpu.memory_space<vmem>>, vector<16x392xbf16>
    %c0_1 = arith.constant 0 : index
    %c0_2 = arith.constant 0 : index
    %c0_3 = arith.constant 0 : index
    %1 = vector.load %arg2[%c0_1, %c0_2, %c0_3] : memref<1x392x256xbf16, #tpu.memory_space<vmem>>, vector<1x392x256xbf16>
    %2 = vector.shape_cast %1 : vector<1x392x256xbf16> to vector<392x256xbf16>
    %cst = arith.constant dense<0.000000e+00> : vector<16x256xf32>
    %3 = tpu.matmul %0, %2, %cst {dimension_numbers = #tpu.dot_dimension_numbers<[1], [0], [0], [1], [0, 0, 1, 1], [], []>} : vector<16x392xbf16>, vector<392x256xbf16>, vector<16x256xf32> -> vector<16x256xf32>
    %cst_4 = arith.constant dense<0.000000e+00> : vector<16xf32>
    %4 = vector.multi_reduction <add>, %3, %cst_4 [1] : vector<16x256xf32> to vector<16xf32>
    %5 = vector.shape_cast %4 : vector<16xf32> to vector<16x1xf32>
    %cst_5 = arith.constant 2.560000e+02 : f32
    %6 = vector.broadcast %cst_5 : f32 to vector<16x1xf32>
    %7 = arith.divf %5, %6 : vector<16x1xf32>
    %8 = vector.broadcast %7 : vector<16x1xf32> to vector<16x256xf32>
    %9 = arith.subf %3, %8 : vector<16x256xf32>
    %10 = arith.mulf %9, %9 : vector<16x256xf32>
    %cst_6 = arith.constant dense<0.000000e+00> : vector<16xf32>
    %11 = vector.multi_reduction <add>, %10, %cst_6 [1] : vector<16x256xf32> to vector<16xf32>
    %12 = vector.shape_cast %11 : vector<16xf32> to vector<16x1xf32>
    %cst_7 = arith.constant 2.560000e+02 : f32
    %13 = vector.broadcast %cst_7 : f32 to vector<16x1xf32>
    %14 = arith.divf %12, %13 : vector<16x1xf32>
    %15 = vector.broadcast %7 : vector<16x1xf32> to vector<16x256xf32>
    %16 = arith.subf %3, %15 : vector<16x256xf32>
    %cst_8 = arith.constant 9.99999974E-6 : f32
    %17 = vector.broadcast %cst_8 : f32 to vector<16x1xf32>
    %18 = arith.addf %14, %17 : vector<16x1xf32>
    %19 = math.rsqrt %18 : vector<16x1xf32>
    %20 = vector.broadcast %19 : vector<16x1xf32> to vector<16x256xf32>
    %21 = arith.mulf %16, %20 : vector<16x256xf32>
    %c0_9 = arith.constant 0 : index
    %c0_10 = arith.constant 0 : index
    %22 = vector.load %arg3[%c0_9, %c0_10] : memref<16x1xf32, #tpu.memory_space<vmem>>, vector<16x1xf32>
    %23 = vector.broadcast %22 : vector<16x1xf32> to vector<16x256xf32>
    %24 = arith.mulf %21, %23 : vector<16x256xf32>
    %c0_11 = arith.constant 0 : index
    %c0_12 = arith.constant 0 : index
    %25 = vector.load %arg4[%c0_11, %c0_12] : memref<16x1xf32, #tpu.memory_space<vmem>>, vector<16x1xf32>
    %26 = vector.broadcast %25 : vector<16x1xf32> to vector<16x256xf32>
    %27 = arith.addf %24, %26 : vector<16x256xf32>
    %cst_13 = arith.constant 0.000000e+00 : f32
    %28 = vector.broadcast %cst_13 : f32 to vector<16x256xf32>
    %29 = arith.maximumf %27, %28 : vector<16x256xf32>
    %c0_14 = arith.constant 0 : index
    %c0_15 = arith.constant 0 : index
    %c0_16 = arith.constant 0 : index
    %30 = vector.load %arg5[%c0_14, %c0_15, %c0_16] : memref<1x16x256xf32, #tpu.memory_space<vmem>>, vector<1x16x256xf32>
    %31 = vector.shape_cast %30 : vector<1x16x256xf32> to vector<16x256xf32>
    %32 = vector.shape_cast %29 : vector<16x256xf32> to vector<1x16x256xf32>
    tpu.vector_store %arg5[%c0_14, %c0_15, %c0_16], %32 {strides = array<i32>} : memref<1x16x256xf32, #tpu.memory_space<vmem>>, vector<1x16x256xf32>,
    return
  }
  func.func @transform_0(%arg0: i32) -> (i32, i32) {
    %c0_i32 = arith.constant 0 : i32
    %c0_i32_0 = arith.constant 0 : i32
    %c0_i32_1 = arith.constant 0 : i32
    return %c0_i32, %c0_i32_0 : i32, i32
  }
  func.func @transform_1(%arg0: i32) -> (i32, i32, i32) {
    %c0_i32 = arith.constant 0 : i32
    %c0_i32_0 = arith.constant 0 : i32
    %c0_i32_1 = arith.constant 0 : i32
    return %arg0, %c0_i32, %c0_i32_0 : i32, i32, i32
  }
  func.func @transform_2(%arg0: i32) -> (i32, i32) {
    %c0_i32 = arith.constant 0 : i32
    %c0_i32_0 = arith.constant 0 : i32
    %c0_i32_1 = arith.constant 0 : i32
    return %c0_i32, %c0_i32_0 : i32, i32
  }
  func.func @transform_3(%arg0: i32) -> (i32, i32) {
    %c0_i32 = arith.constant 0 : i32
    %c0_i32_0 = arith.constant 0 : i32
    %c0_i32_1 = arith.constant 0 : i32
    return %c0_i32, %c0_i32_0 : i32, i32
  }
  func.func @transform_4(%arg0: i32) -> (i32, i32, i32) {
    %c0_i32 = arith.constant 0 : i32
    %c0_i32_0 = arith.constant 0 : i32
    %c0_i32_1 = arith.constant 0 : i32
    return %arg0, %c0_i32, %c0_i32_0 : i32, i32, i32
  }
}

</mosaic_0001>

<bundles_post_ra>
// kernel: tpu_custom_call.1
= control target key start
LH: loop header
LB: loop body
LE: loop exit
PB: predicated region body
PF: predicated region fallthrough
CT: control target
= control target key end

     0   :  { %9 = vsyncpa [#allocation3], 0  ;;  %s1585_s0 = inlined_call_operand.vmem [shape: bf16[16,392], index: 0, kind: input, shape index: {}]   ;;  %s1586_s1 = inlined_call_operand.hbm [shape: bf16[2,392,256], index: 1, kind: input, shape index: {}]   ;;  %s1587_s2 = inlined_call_operand.vmem [shape: f32[16,1], index: 2, kind: input, shape index: {}]   ;;  %s1588_s3 = inlined_call_operand.vmem [shape: f32[16,1], index: 3, kind: input, shape index: {}]   ;;  %s1589_s4 = inlined_call_operand.hbm [shape: f32[2,16,256], index: 4, kind: output, shape index: {}]  }
   0x1   :  { %11 = vsyncpa [#allocation3 + $0x1], 0 }
   0x2   :  { %12 = vsyncpa [#allocation4], 0 }
   0x3   :  { %14 = vsyncpa [#allocation4 + $0x1], 0  ;;  %s1312_s15 = smov 0   ;;  %s1314_s16 = smov 0  }
   0x4   :  { %s1316_s17 = smov 0   ;;  %s1318_s18 = smov 0  }
   0x5 LB: > { %s1333_s19 = sadd.s32 4294967295, %s1279_s18   ;;  %s845_s20 = sadd.s32 4294967294, %s1279_s18   ;;  %s1279_s18 = sphi %s1318_s18, %s1597_s18   ;;  %s1275_s17 = sphi %s1316_s17, %s1596_s17   ;;  %s1271_s16 = sphi %s1314_s16, %s1595_s16   ;;  %s1267_s15 = sphi %s1312_s15, %s1594_s15  }
   0x6   : > { %s1337_s21 = sadd.s32 1, %s1279_s18   ;;  %s48_s22 = sadd.s32 1, %s1275_s17 }
   0x7   : > { %s45_s23 = ssub.s32 %s1279_s18, %s1337_s21  ;;  %p55_p0 = scmp.ne.s32.totalorder %s1275_s17, %s1271_s16 }
   0x8   : > { %p46_p1 = scmp.eq.s32.totalorder %s45_s23, 0  ;;  %p56_p2 = scmp.eq.s32.totalorder %s1279_s18, 0 }
   0x9   : > { %p61_p3 = scmp.ne.s32.totalorder %s1271_s16, %s1267_s15  ;;  %p62_p4 = scmp.eq.s32.totalorder %s1333_s19, 0 }
   0xa   : > { %s1349_s24 = scalar_select %p46_p1, %s1275_s17, %s48_s22  }
   0xb   : > { %p57_p5 = por %p56_p2, %p55_p0  ;;  %p1351_p6 = por %p62_p4, %p61_p3 }
   0xc   : > { %p127_p7 = scmp.eq.s32.totalorder %s1333_s19, 1  ;;  %p133_p8 = scmp.eq.s32.totalorder %s845_s20, 1 }
   0xd   : > { %p847_p9 = scmp.ge.s32.totalorder %s1279_s18, 2  ;;  %p1134_p10 = scmp.lt.s32.totalorder %s1279_s18, 2 }
   0xe   : > { %p1358_p11 = por %p127_p7, %p55_p0  ;;  %p1362_p12 = por %p133_p8, %p61_p3 }
   0xf   : > { %s162_s28 = sand.u32 1, %s1275_s17   ;;  %s1120_s29 = smul.u32 392, %s1279_s18 }
  0x10   : > { %s1119_s30 = smul.u32 392, %s162_s28  ;;  %p1371_p13 = pnand %p1134_p10, %p57_p5 }
  0x11   : > { %s171_s7 = scalar_lea.hbm %s1586_s1, %s1120_s29  ;;  %s163_s12 = scalar_lea.sflag [#allocation3], %s162_s28 }
  0x12   : > { %s172_s9 = sshll.u32 %s171_s7, 4  ;;  %s166_s10 = scalar_lea.vmem [#allocation2], %s1119_s30  ;;  %s173_s9 = int_to_ptr.hbm [resolvable:$true] %s172_s9 }
  0x13   : > { %s174_s11 = sshll.u32 %s166_s10, 4  ;;  %s1183_s13 = sshra.s32 %s173_s9, 4  ;;  %s175_s11 = int_to_ptr.vmem [resolvable:$true] %s174_s11  ;;  %s1184_s13 = int_to_ptr.hbm [resolvable:$true] %s1183_s13 }
  0x14   : > { %s1185_s14 = scalar_lea.hbm %s1184_s13, 392  ;;  %p1187_p1 = pneg %p1371_p13 }
  0x15   : > { %p1186_p0 = scmp.ne.s32.totalorder %s1184_s13, %s1185_s14  ;;  %s1190_s23 = scalar_lea.hbm %s1586_s1, 784 }
  0x16   : > { %p1191_p4 = scmp.lt.s32.totalorder %s1184_s13, %s1586_s1  ;;  %p1192_p5 = scmp.lt.s32.totalorder %s1190_s23, %s1185_s14 }
  0x17   : > { %p1188_p2 = pnand %p1187_p1, %p1186_p0 }
  0x18   : > { %p1193_p7 = por %p1192_p5, %p1191_p4 }
  0x19   : > { %p1189_p3 = pneg %p1188_p2 }
  0x1b   : > { %p1194_p8 = pnand %p1193_p7, %p1189_p3 }
  0x1d   : > { %1197 = shalt.err (!%p1194_p8)
}
  0x1e   : > { %s1281_s28 = smov 128   ;;  %s1282_s30 = smov 8  }
  0x1f   : > { %1129 = dma.hbm_to_vmem [thread:$0]  (!%p1371_p13), %s173_s9, 6272, %s175_s11, %s163_s12, %s1281_s28, %s1281_s28, %s1282_s30  }
  0x20   : > { %p849_p10 = scmp.ge.s32.totalorder %s1279_s18, 1  ;;  %p182_p0 = scmp.lt.s32.totalorder %s1279_s18, 3 }
  0x22   : > { %p183_p1 = pnand %p849_p10, %p182_p0 }
  0x23   : > { %s1388_s6 = sand.u32 (!%p183_p1), 1, %s1271_s16  }
  0x24   : > { %186 = sbr.rel (%p183_p1) target bundleno = 525 (0x20d), region = 36  ;;  %s189_s10 = scalar_lea.sflag (!%p183_p1), [#allocation3], %s1388_s6 }
  0x25   : > { %s1121_s7 = smul.u32 (!%p183_p1), 392, %s1388_s6 }
  0x27   : > { %s1392_s13 = scalar_lea.vmem (!%p183_p1), [#allocation2], %s1121_s7 }
  0x29   : > { %1258 = dma.done.wait (%p1351_p6), %s189_s10, 6272  }
  0x2a   : > { %1260 = vsyncadd (%p1351_p6), %s189_s10, 4294961024  ;;  %v925_v0 = vld [vmem:[%s1392_s13 + $0x70] sm:$0xf]  ;;  %v1085_v1 = vld [vmem:[%s1392_s13 + $0x74] sm:$0xf0]  ;;  %vm540_vm0 = vcmask 1043456  }
  0x2b   : > { %v989_v2 = vld [vmem:[%s1392_s13 + $0xf0] sm:$0xf]  ;;  %v926_v3 = vor.u32 %v1085_v1, %v925_v0  ;;  %v1101_v4 = vld [vmem:[%s1392_s13 + $0xf4] sm:$0xf0]  ;;  %v917_v9 = vld [vmem:[%s1392_s13 + $0x60] sm:$0xf] }
  0x2c   : > { %v1053_v5 = vld [vmem:[%s1392_s13 + $0x170] sm:$0xf]  ;;  %v1117_v6 = vld [vmem:[%s1392_s13 + $0x174] sm:$0xf0]  ;;  %v990_v7 = vor.u32 %v1101_v4, %v989_v2  ;;  %v1083_v10 = vld [vmem:[%s1392_s13 + $0x64] sm:$0xf0] }
  0x2d   : > { %v1054_v8 = vor.u32 %v1117_v6, %v1053_v5  ;;  %v981_v11 = vld [vmem:[%s1392_s13 + $0xe0] sm:$0xf]  ;;  %547 = vmatpush.bf16.msra.mxu0 %v926_v3  ;;  %v918_v12 = vor.u32 %v1083_v10, %v917_v9  ;;  %v1099_v13 = vld [vmem:[%s1392_s13 + $0xe4] sm:$0xf0]  ;;  %v909_v18 = vld [vmem:[%s1392_s13 + $0x50] sm:$0xf] }
  0x2e   : > { %v1045_v14 = vld [vmem:[%s1392_s13 + $0x160] sm:$0xf]  ;;  %v1115_v15 = vld [vmem:[%s1392_s13 + $0x164] sm:$0xf0]  ;;  %561 = vmatpush.bf16.msra.mxu1 %v990_v7  ;;  %v982_v16 = vor.u32 %v1099_v13, %v981_v11  ;;  %v1081_v19 = vld [vmem:[%s1392_s13 + $0x54] sm:$0xf0] }
  0x2f   : > { %575 = vmatpush.bf16.msra.mxu2 %v1054_v8  ;;  %v1046_v17 = vor.u32 %v1115_v15, %v1045_v14  ;;  %v973_v20 = vld [vmem:[%s1392_s13 + $0xd0] sm:$0xf]  ;;  %v1097_v21 = vld [vmem:[%s1392_s13 + $0xd4] sm:$0xf0]  ;;  %v910_v24 = vor.u32 %v1081_v19, %v909_v18  ;;  %v901_v25 = vld [vmem:[%s1392_s13 + $0x40] sm:$0xf] }
  0x30   : > { %v1037_v22 = vld [vmem:[%s1392_s13 + $0x150] sm:$0xf]  ;;  %v1113_v23 = vld [vmem:[%s1392_s13 + $0x154] sm:$0xf0]  ;;  %v1079_v26 = vld [vmem:[%s1392_s13 + $0x44] sm:$0xf0]  ;;  %v974_v28 = vor.u32 %v1097_v21, %v973_v20 }
  0x31   : > { %548 = vmatpush.bf16.msra.mxu0 %v918_v12  ;;  %v965_v27 = vld [vmem:[%s1392_s13 + $0xc0] sm:$0xf]  ;;  %v1038_v29 = vor.u32 %v1113_v23, %v1037_v22  ;;  %v1084_v31 = vld [vmem:[%s1392_s13 + $0x74] sm:$0xf]  ;;  %v927_v32 = vld [vmem:[%s1392_s13 + $0x78] sm:$0xf0]  ;;  %v902_v37 = vor.u32 %v1079_v26, %v901_v25 }
  0x32   : > { %562 = vmatpush.bf16.msra.mxu1 %v982_v16  ;;  %v1420_v30 = vld [vmem:[%s1392_s13 + $0x180] sm:$0xff]  ;;  %v1095_v33 = vld [vmem:[%s1392_s13 + $0xc4] sm:$0xf0]  ;;  %v930_v39 = vor.u32 %v1084_v31, %v927_v32  ;;  %v893_v40 = vld [vmem:[%s1392_s13 + $0x30] sm:$0xf]  ;;  %vm536_vm1 = vcmask 64512  }
  0x33   : > { %576 = vmatpush.bf16.msra.mxu2 %v1046_v17  ;;  %v1029_v34 = vld [vmem:[%s1392_s13 + $0x140] sm:$0xf]  ;;  %v1111_v35 = vld [vmem:[%s1392_s13 + $0x144] sm:$0xf0]  ;;  %v436_v36 = vunpack.c.l.b16 %v1420_v30  ;;  %v1077_v41 = vld [vmem:[%s1392_s13 + $0x34] sm:$0xf0]  ;;  %v966_v43 = vor.u32 %v1095_v33, %v965_v27  ;;  %v437_v19 = vunpack.c.h.b16 %v1420_v30 }
  0x34   : > { %v957_v42 = vld [vmem:[%s1392_s13 + $0xb0] sm:$0xf]  ;;  %v1030_v44 = vor.u32 %v1111_v35, %v1029_v34  ;;  %v1093_v45 = vld [vmem:[%s1392_s13 + $0xb4] sm:$0xf0]  ;;  %v1082_v46 = vld [vmem:[%s1392_s13 + $0x64] sm:$0xf]  ;;  %v894_v51 = vor.u32 %v1077_v41, %v893_v40 }
  0x35   : > { %549 = vmatpush.bf16.msra.mxu0 %v910_v24  ;;  %v486_v38 = vpack.c.b16 %v436_v36, %v436_v36  ;;  %v919_v47 = vld [vmem:[%s1392_s13 + $0x68] sm:$0xf0]  ;;  %v1021_v49 = vld [vmem:[%s1392_s13 + $0x130] sm:$0xf]  ;;  %v1109_v50 = vld [vmem:[%s1392_s13 + $0x134] sm:$0xf0]  ;;  %v958_v55 = vor.u32 %v1093_v45, %v957_v42  ;;  %v487_v36 = vpack.c.b16 %v437_v19, %v437_v19 }
  0x36   : > { %563 = vmatpush.bf16.msra.mxu1 %v974_v28  ;;  %v922_v52 = vor.u32 %v1082_v46, %v919_v47  ;;  %v885_v53 = vld [vmem:[%s1392_s13 + $0x20] sm:$0xf]  ;;  %v1075_v54 = vld [vmem:[%s1392_s13 + $0x24] sm:$0xf0]  ;;  %v1022_v56 = vor.u32 %v1109_v50, %v1021_v49  ;;  %v1080_v58 = vld [vmem:[%s1392_s13 + $0x54] sm:$0xf] }
  0x37   : > { %577 = vmatpush.bf16.msra.mxu2 %v1038_v29  ;;  %v542_v48 = vsel %vm540_vm0, %v486_v38, 0  ;;  %v949_v57 = vld [vmem:[%s1392_s13 + $0xa0] sm:$0xf]  ;;  %v911_v59 = vld [vmem:[%s1392_s13 + $0x58] sm:$0xf0]  ;;  %v886_v0 = vor.u32 %v1075_v54, %v885_v53  ;;  %v545_v53 = vsel %vm540_vm0, %v487_v36, 0 }
  0x38   : > { %596 = vmatpush.bf16.msra.mxu3 %v542_v48  ;;  %v1091_v60 = vld [vmem:[%s1392_s13 + $0xa4] sm:$0xf0]  ;;  %v1013_v61 = vld [vmem:[%s1392_s13 + $0x120] sm:$0xf]  ;;  %v877_v63 = vld [vmem:[%s1392_s13 + $0x10] sm:$0xf]  ;;  %v914_v1 = vor.u32 %v1080_v58, %v911_v59 }
  0x39   : > { %550 = vmatpush.bf16.msra.mxu0 %v902_v37  ;;  %v1107_v62 = vld [vmem:[%s1392_s13 + $0x124] sm:$0xf0]  ;;  %v1073_v2 = vld [vmem:[%s1392_s13 + $0x14] sm:$0xf0]  ;;  %v941_v3 = vld [vmem:[%s1392_s13 + $0x90] sm:$0xf]  ;;  %v950_v5 = vor.u32 %v1091_v60, %v949_v57 }
  0x3a   : > { %564 = vmatpush.bf16.msra.mxu1 %v966_v43  ;;  %v1089_v4 = vld [vmem:[%s1392_s13 + $0x94] sm:$0xf0]  ;;  %v1014_v6 = vor.u32 %v1107_v62, %v1013_v61  ;;  %v1078_v7 = vld [vmem:[%s1392_s13 + $0x44] sm:$0xf]  ;;  %v903_v8 = vld [vmem:[%s1392_s13 + $0x48] sm:$0xf0]  ;;  %v878_v14 = vor.u32 %v1073_v2, %v877_v63 }
  0x3b   : > { %578 = vmatpush.bf16.msra.mxu2 %v1030_v44  ;;  %v1067_v9 = vld [vmem:[%s1585_s0 + $0xc] sm:$0xf]  ;;  %v1005_v10 = vld [vmem:[%s1392_s13 + $0x110] sm:$0xf]  ;;  %v1105_v11 = vld [vmem:[%s1392_s13 + $0x114] sm:$0xf0]  ;;  %v906_v15 = vor.u32 %v1078_v7, %v903_v8  ;;  %v942_v20 = vor.u32 %v1089_v4, %v941_v3 }
  0x3c   : > { %603 = vmatpush.bf16.msrb.mxu3 %v930_v39  ;;  %v863_v12 = vld [vmem:[%s1585_s0 + $0x18] sm:$0xf0]  ;;  %v869_v16 = vld [vmem:[%s1392_s13] sm:$0xf]  ;;  %v1071_v17 = vld [vmem:[%s1392_s13 + $0x4] sm:$0xf0]  ;;  %v1006_v21 = vor.u32 %v1105_v11, %v1005_v10 }
  0x3d   : > { %551 = vmatpush.bf16.msra.mxu0 %v894_v51  ;;  %v1459_v13 = vor.u32 %v1067_v9, %v863_v12  ;;  %v933_v18 = vld [vmem:[%s1392_s13 + $0x80] sm:$0xf]  ;;  %v1087_v22 = vld [vmem:[%s1392_s13 + $0x84] sm:$0xf0]  ;;  %v1076_v23 = vld [vmem:[%s1392_s13 + $0x34] sm:$0xf]  ;;  %v870_v30 = vor.u32 %v1071_v17, %v869_v16 }
  0x3e   : > { %565 = vmatpush.bf16.msra.mxu1 %v958_v55  ;;  %v895_v24 = vld [vmem:[%s1392_s13 + $0x38] sm:$0xf0]  ;;  %v997_v25 = vld [vmem:[%s1392_s13 + $0x100] sm:$0xf]  ;;  %v1103_v26 = vld [vmem:[%s1392_s13 + $0x104] sm:$0xf0]  ;;  %v934_v37 = vor.u32 %v1087_v22, %v933_v18 }
  0x3f   : > { %579 = vmatpush.bf16.msra.mxu2 %v1022_v56  ;;  %v1100_v27 = vld [vmem:[%s1392_s13 + $0xf4] sm:$0xf]  ;;  %1059 = vmatmul.msk.bf16.vlgmr.msra.gmra.mxu3 %vm536_vm1, %v1459_v13  ;;  %v991_v28 = vld [vmem:[%s1392_s13 + $0xf8] sm:$0xf0]  ;;  %v861_v32 = vld [vmem:[%s1585_s0 + $0x8] sm:$0xf]  ;;  %v898_v33 = vor.u32 %v1076_v23, %v895_v24  ;;  %v998_v38 = vor.u32 %v1103_v26, %v997_v25 }
  0x40   : > { %604 = vmatpush.bf16.msrb.mxu3 %v922_v52  ;;  %v1116_v29 = vld [vmem:[%s1392_s13 + $0x174] sm:$0xf]  ;;  %v1055_v31 = vld [vmem:[%s1392_s13 + $0x178] sm:$0xf0]  ;;  %v853_v34 = vld [vmem:[%s1585_s0] sm:$0xf]  ;;  %v994_v42 = vor.u32 %v1100_v27, %v991_v28 }
  0x41   : > { %552 = vmatpush.bf16.msra.mxu0 %v886_v0  ;;  %v1068_v35 = vld [vmem:[%s1585_s0 + $0xc] sm:$0xf0]  ;;  %v1069_v39 = vld [vmem:[%s1585_s0 + $0x14] sm:$0xf0]  ;;  %v1066_v40 = vld [vmem:[%s1585_s0 + $0x4] sm:$0xf]  ;;  %v1058_v43 = vor.u32 %v1116_v29, %v1055_v31 }
  0x42   : > { %566 = vmatpush.bf16.msra.mxu1 %v950_v5  ;;  %v855_v41 = vld [vmem:[%s1585_s0 + $0x10] sm:$0xf0]  ;;  %v1098_v44 = vld [vmem:[%s1392_s13 + $0xe4] sm:$0xf]  ;;  %v854_v50 = vor.u32 %v1068_v35, %v853_v34  ;;  %v1500_v51 = vor.u32 %v1069_v39, %v861_v32  ;;  %v879_v59 = vld [vmem:[%s1392_s13 + $0x18] sm:$0xf0] }
  0x43   : > { %580 = vmatpush.bf16.msra.mxu2 %v1014_v6  ;;  %v1074_v45 = vld [vmem:[%s1392_s13 + $0x24] sm:$0xf]  ;;  %v887_v46 = vld [vmem:[%s1392_s13 + $0x28] sm:$0xf0]  ;;  %v1502_v52 = vor.u32 %v1066_v40, %v855_v41  ;;  %v1096_v57 = vld [vmem:[%s1392_s13 + $0xd4] sm:$0xf] }
  0x44   : > { %605 = vmatpush.bf16.msrb.mxu3 %v914_v1  ;;  %v983_v47 = vld [vmem:[%s1392_s13 + $0xe8] sm:$0xf0]  ;;  %v1114_v48 = vld [vmem:[%s1392_s13 + $0x164] sm:$0xf]  ;;  %v890_v54 = vor.u32 %v1074_v45, %v887_v46  ;;  %v1072_v58 = vld [vmem:[%s1392_s13 + $0x14] sm:$0xf] }
  0x45   : > { %553 = vmatpush.bf16.msra.mxu0 %v878_v14  ;;  %v1047_v49 = vld [vmem:[%s1392_s13 + $0x168] sm:$0xf0]  ;;  %v986_v55 = vor.u32 %v1098_v44, %v983_v47  ;;  %v975_v60 = vld [vmem:[%s1392_s13 + $0xd8] sm:$0xf0]  ;;  %v1112_v61 = vld [vmem:[%s1392_s13 + $0x154] sm:$0xf]  ;;  %v882_v63 = vor.u32 %v1072_v58, %v879_v59 }
  0x46   : > { %567 = vmatpush.bf16.msra.mxu1 %v942_v20  ;;  %v1050_v56 = vor.u32 %v1114_v48, %v1047_v49  ;;  %v1039_v62 = vld [vmem:[%s1392_s13 + $0x158] sm:$0xf0]  ;;  %v978_v0 = vor.u32 %v1096_v57, %v975_v60  ;;  %v1094_v2 = vld [vmem:[%s1392_s13 + $0xc4] sm:$0xf]  ;;  %v871_v4 = vld [vmem:[%s1392_s13 + $0x8] sm:$0xf0] }
  0x47   : > { %581 = vmatpush.bf16.msra.mxu2 %v1006_v21  ;;  %v1042_v1 = vor.u32 %v1112_v61, %v1039_v62  ;;  %v1070_v3 = vld [vmem:[%s1392_s13 + $0x4] sm:$0xf]  ;;  %v967_v5 = vld [vmem:[%s1392_s13 + $0xc8] sm:$0xf0]  ;;  %v1092_v11 = vld [vmem:[%s1392_s13 + $0xb4] sm:$0xf] }
  0x48   : > { %606 = vmatpush.bf16.msrb.mxu3 %v906_v15  ;;  %v1110_v6 = vld [vmem:[%s1392_s13 + $0x144] sm:$0xf]  ;;  %v1031_v7 = vld [vmem:[%s1392_s13 + $0x148] sm:$0xf0]  ;;  %v874_v8 = vor.u32 %v1070_v3, %v871_v4  ;;  %v970_v9 = vor.u32 %v1094_v2, %v967_v5  ;;  %v959_v12 = vld [vmem:[%s1392_s13 + $0xb8] sm:$0xf0] }
  0x49   : > { %554 = vmatpush.bf16.msra.mxu0 %v870_v30  ;;  %v1034_v10 = vor.u32 %v1110_v6, %v1031_v7  ;;  %v1108_v14 = vld [vmem:[%s1392_s13 + $0x134] sm:$0xf]  ;;  %v1023_v15 = vld [vmem:[%s1392_s13 + $0x138] sm:$0xf0]  ;;  %v962_v16 = vor.u32 %v1092_v11, %v959_v12  ;;  %v1090_v18 = vld [vmem:[%s1392_s13 + $0xa4] sm:$0xf] }
  0x4a   : > { %568 = vmatpush.bf16.msra.mxu1 %v934_v37  ;;  %v1026_v17 = vor.u32 %v1108_v14, %v1023_v15  ;;  %v951_v19 = vld [vmem:[%s1392_s13 + $0xa8] sm:$0xf0]  ;;  %v1106_v20 = vld [vmem:[%s1392_s13 + $0x124] sm:$0xf]  ;;  %v1088_v24 = vld [vmem:[%s1392_s13 + $0x94] sm:$0xf] }
  0x4b   : > { %582 = vmatpush.bf16.msra.mxu2 %v998_v38  ;;  %v1015_v21 = vld [vmem:[%s1392_s13 + $0x128] sm:$0xf0]  ;;  %v954_v22 = vor.u32 %v1090_v18, %v951_v19  ;;  %v943_v25 = vld [vmem:[%s1392_s13 + $0x98] sm:$0xf0]  ;;  %v1104_v26 = vld [vmem:[%s1392_s13 + $0x114] sm:$0xf] }
  0x4c   : > { %607 = vmatpush.bf16.msrb.mxu3 %v898_v33  ;;  %555 = vmatmul.bf16.vlgmr.msra.gmra.mxu0 %v854_v50  ;;  %v1018_v23 = vor.u32 %v1106_v20, %v1015_v21  ;;  %v1007_v27 = vld [vmem:[%s1392_s13 + $0x118] sm:$0xf0]  ;;  %v946_v28 = vor.u32 %v1088_v24, %v943_v25  ;;  %v1086_v31 = vld [vmem:[%s1392_s13 + $0x84] sm:$0xf]  ;;  %v935_v30 = vld [vmem:[%s1392_s13 + $0x88] sm:$0xf0] }
  0x4d   : > { %617 = vmatpush.bf16.msrb.mxu0 %v994_v42  ;;  %569 = vmatmul.bf16.vlgmr.msra.gmra.mxu1 %v1502_v52  ;;  %v1010_v29 = vor.u32 %v1104_v26, %v1007_v27  ;;  %v1102_v32 = vld [vmem:[%s1392_s13 + $0x104] sm:$0xf]  ;;  %v999_v33 = vld [vmem:[%s1392_s13 + $0x108] sm:$0xf0]  ;;  %v938_v34 = vor.u32 %v1086_v31, %v935_v30  ;;  %v1284_v6 = vmov 0   ;;  %s850_s23 = sshll.u32 %s1388_s6, 5 }
  0x4e   : > { %631 = vmatpush.bf16.msrb.mxu1 %v1058_v43  ;;  %583 = vmatmul.bf16.vlgmr.msra.gmra.mxu2 %v1500_v51  ;;  %v1002_v35 = vor.u32 %v1102_v32, %v999_v33  ;;  %v732_v4 = vld [vmem:[%s1588_s3] sm:$0xff]  ;;  %v717_v26 = vld [vmem:[%s1587_s2 + $0x8] sm:$0xff]  ;;  %s1118_s29 = sshll.u32 %s1333_s19, 5  ;;  %s217_s5 = scalar_lea.vmem [#allocation5], %s850_s23 }
  0x4f   : > { %652 = vmatpush.bf16.msrb.mxu2 %v545_v53  ;;  %1175 = vset.pattern.permute.xlu0 %v1284_v6  ;;  %v716_v20 = vld [vmem:[%s1587_s2] sm:$0xff]  ;;  %v733_v27 = vld [vmem:[%s1588_s3 + $0x8] sm:$0xff]  ;;  %s768_s7 = scalar_lea.hbm %s1589_s4, %s1118_s29  ;;  %s769_s19 = sshll.u32 %s217_s5, 4  ;;  %s770_s19 = int_to_ptr.vmem [resolvable:$true] %s769_s19 }
  0x50   : > { %608 = vmatpush.bf16.msrb.mxu3 %v890_v54  ;;  %1176 = vset.pattern.permute.xlu1 %v1284_v6  ;;  %s771_s10 = sshll.u32 %s768_s7, 4  ;;  %s757_s25 = scalar_lea.sflag [#allocation4], %s1388_s6  ;;  %s772_s10 = int_to_ptr.hbm [resolvable:$true] %s771_s10 }
  0x51   : > { %618 = vmatpush.bf16.msrb.mxu0 %v986_v55  ;;  %1174 = vset.pattern.permute.xlu2 %v1284_v6  ;;  %s1227_s13 = sshra.s32 %s772_s10, 4  ;;  %s1233_s12 = scalar_lea.hbm %s1589_s4, 64  ;;  %s1228_s13 = int_to_ptr.hbm [resolvable:$true] %s1227_s13 }
  0x52   : > { %632 = vmatpush.bf16.msrb.mxu1 %v1050_v56  ;;  %720 = vperm.xlu2 %1174, %v716_v20   ;;  %s1229_s8 = scalar_lea.hbm %s1228_s13, 32  ;;  %p1234_p3 = scmp.lt.s32.totalorder %s1228_s13, %s1589_s4 }
  0x53   : > { %p1230_p6 = scmp.ne.s32.totalorder %s1228_s13, %s1229_s8  ;;  %p1235_p4 = scmp.lt.s32.totalorder %s1233_s12, %s1229_s8 }
  0x54   : > { %609 = vmatpush.bf16.msrb.mxu3 %v882_v63 }
  0x55   : > { %619 = vmatpush.bf16.msrb.mxu0 %v978_v0  ;;  %p1231_p13 = pnand %p1230_p6, %p1358_p11  ;;  %p1236_p5 = por %p1235_p4, %p1234_p3 }
  0x56   : > { %633 = vmatpush.bf16.msrb.mxu1 %v1042_v1  ;;  %v1283_v1 = vmov 256.0  }
  0x57   : > { %1177 = vrcp.f32 %v1283_v1  ;;  %p1232_p2 = pneg %p1231_p13 }
  0x58   : > { %610 = vmatpush.bf16.msrb.mxu3 %v874_v8 }
  0x59   : > { %620 = vmatpush.bf16.msrb.mxu0 %v970_v9  ;;  %p1237_p7 = pnand %p1236_p5, %p1232_p2 }
  0x5a   : > { %634 = vmatpush.bf16.msrb.mxu1 %v1034_v10  ;;  %725 = vperm.xlu2 %1174, %v717_v26  }
  0x5b   : > { %611 = vmatmul.bf16.vlgmr.msrb.gmra.mxu3 %v854_v50 }
  0x5d   : > { %621 = vmatpush.bf16.msrb.mxu0 %v962_v16  ;;  %v1178_v2 = vpop.eup %1177 }
  0x5e   : > { %635 = vmatpush.bf16.msrb.mxu1 %v1026_v17  ;;  %1060 = vmatmul.msk.bf16.vlgmr.msrb.gmra.mxu2 %vm536_vm1, %v1459_v13  ;;  %v666_v3 = vmul.f32 256.0, %v1178_v2  ;;  %vm670_vm2 = vweird.f32 %v1178_v2 }
  0x60   : > { %v667_v5 = vsub.f32 1.0, %v666_v3 }
  0x61   : > { %622 = vmatpush.bf16.msrb.mxu0 %v954_v22 }
  0x62   : > { %636 = vmatpush.bf16.msrb.mxu1 %v1018_v23  ;;  %v668_v7 = vmul.f32 %v1178_v2, %v667_v5 }
  0x64   : > { %v669_v8 = vadd.f32 %v1178_v2, %v668_v7 }
  0x65   : > { %623 = vmatpush.bf16.msrb.mxu0 %v946_v28 }
  0x66   : > { %637 = vmatpush.bf16.msrb.mxu1 %v1010_v29  ;;  %v671_v9 = vsel %vm670_vm2, %v1178_v2, %v669_v8 }
  0x69   : > { %624 = vmatpush.bf16.msrb.mxu0 %v938_v34 }
  0x6a   : > { %638 = vmatpush.bf16.msrb.mxu1 %v1002_v35 }
  0x6c   : > { %625 = vmatmul.bf16.vlgmr.msrb.gmra.mxu0 %v1502_v52 }
  0x6d   : > { %639 = vmatmul.bf16.vlgmr.msrb.gmra.mxu1 %v1500_v51 }
  0xc2   : > { %v598_v36 = vpop.f32.mrf.mxu3 }
  0xc9   : > { %v556_v13 = vpop.f32.mrf.mxu0 }
  0xca   : > { %v570_v37 = vpop.f32.mrf.mxu1  ;;  %v600_v39 = vpop.f32.mrf.mxu3 }
  0xcb   : > { %v571_v43 = vadd.f32 %v570_v37, %v556_v13 }
  0xd1   : > { %v584_v38 = vpop.f32.mrf.mxu2  ;;  %v558_v40 = vpop.f32.mrf.mxu0 }
  0xd2   : > { %v572_v41 = vpop.f32.mrf.mxu1  ;;  %v585_v47 = vadd.f32 %v584_v38, %v571_v43 }
  0xd3   : > { %v573_v53 = vadd.f32 %v572_v41, %v558_v40 }
  0xd4   : > { %v599_v52 = vadd.f32 %v598_v36, %v585_v47 }
  0xd9   : > { %v586_v42 = vpop.f32.mrf.mxu2 }
  0xda   : > { %v587_v57 = vadd.f32 %v586_v42, %v573_v53  ;;  %v721_v42 = vpop.permute.xlu2 %720 }
  0xdc   : > { %v601_v62 = vadd.f32 %v600_v39, %v587_v57 }
  0xde   : > { %v612_v44 = vpop.f32.mrf.mxu3 }
  0xe1   : > { %v654_v49 = vpop.f32.mrf.mxu2 }
  0xe6   : > { %v614_v55 = vpop.f32.mrf.mxu3 }
  0xe9   : > { %v626_v45 = vpop.f32.mrf.mxu0  ;;  %v656_v61 = vpop.f32.mrf.mxu2 }
  0xea   : > { %v640_v46 = vpop.f32.mrf.mxu1  ;;  %v627_v48 = vadd.f32 %v626_v45, %v612_v44 }
  0xec   : > { %v641_v50 = vadd.f32 %v640_v46, %v627_v48 }
  0xee   : > { %v655_v54 = vadd.f32 %v654_v49, %v641_v50 }
  0xf0   : > { %v659_v51 = vadd.f32 %v655_v54, %v599_v52 }
  0xf1   : > { %v628_v56 = vpop.f32.mrf.mxu0 }
  0xf2   : > { %v629_v58 = vadd.f32 %v628_v56, %v614_v55  ;;  %660 = vadd.xlane.f32.xlu0 %v659_v51  ;;  %v642_v59 = vpop.f32.mrf.mxu1 }
  0xf4   : > { %v643_v60 = vadd.f32 %v642_v59, %v629_v58  ;;  %v726_v59 = vpop.permute.xlu2 %725 }
  0xf6   : > { %v657_v63 = vadd.f32 %v656_v61, %v643_v60 }
  0xf8   : > { %v662_v0 = vadd.f32 %v657_v63, %v601_v62 }
  0xfa   : > { %663 = vadd.xlane.f32.xlu0 %v662_v0 }
 0x10e   : > { %736 = vperm.xlu0 %1175, %v732_v4  }
 0x165   : > { %v661_v10 = vpop.xlane.xlu0 %660 }
 0x166   : > { %v672_v11 = vmul.f32 %v671_v9, %v661_v10 }
 0x168   : > { %v674_v12 = vsub.f32 %v599_v52, %v672_v11  ;;  %v675_v14 = vsub.f32 %v655_v54, %v672_v11 }
 0x16a   : > { %v678_v15 = vmul.f32 %v674_v12, %v674_v12  ;;  %v679_v16 = vmul.f32 %v675_v14, %v675_v14 }
 0x16c   : > { %v682_v17 = vadd.f32 %v679_v16, %v678_v15 }
 0x16d   : > { %v664_v18 = vpop.xlane.xlu0 %663 }
 0x16e   : > { %v673_v19 = vmul.f32 %v671_v9, %v664_v18  ;;  %683 = vadd.xlane.f32.xlu1 %v682_v17 }
 0x170   : > { %v676_v21 = vsub.f32 %v601_v62, %v673_v19  ;;  %v677_v22 = vsub.f32 %v657_v63, %v673_v19 }
 0x172   : > { %v680_v23 = vmul.f32 %v676_v21, %v676_v21  ;;  %v681_v24 = vmul.f32 %v677_v22, %v677_v22 }
 0x174   : > { %v685_v25 = vadd.f32 %v681_v24, %v680_v23 }
 0x176   : > { %686 = vadd.xlane.f32.xlu1 %v685_v25 }
 0x180   : > { %v737_v47 = vpop.permute.xlu0 %736 }
 0x18f   : > { %741 = vperm.xlu1 %1176, %v733_v27  }
 0x1e1   : > { %v684_v28 = vpop.xlane.xlu1 %683 }
 0x1e2   : > { %v688_v29 = vmul.f32 %v684_v28, %v671_v9 }
 0x1e4   : > { %v690_v31 = vadd.f32 1e-05, %v688_v29 }
 0x1e6   : > { %1179 = vrsqrt.f32 %v690_v31  ;;  %vm698_vm4 = vweird.f32 %v690_v31 }
 0x1e9   : > { %v687_v30 = vpop.xlane.xlu1 %686 }
 0x1ea   : > { %v689_v32 = vmul.f32 %v687_v30, %v671_v9 }
 0x1ec   : > { %v1180_v33 = vpop.eup %1179  ;;  %v691_v34 = vadd.f32 1e-05, %v689_v32 }
 0x1ed   : > { %v693_v35 = vmul.f32 %v1180_v33, %v690_v31  ;;  %vm699_vm3 = vweird.f32 %v1180_v33 }
 0x1ee   : > { %1181 = vrsqrt.f32 %v691_v34  ;;  %vm700_vm5 = vmor %vm698_vm4, %vm699_vm3  ;;  %vm708_vm7 = vweird.f32 %v691_v34 }
 0x1ef   : > { %v694_v36 = vmul.f32 %v1180_v33, %v693_v35 }
 0x1f1   : > { %v695_v13 = vmul.f32 0.5, %v694_v36 }
 0x1f3   : > { %v696_v37 = vsub.f32 1.5, %v695_v13 }
 0x1f4   : > { %v1182_v38 = vpop.eup %1181 }
 0x1f5   : > { %v703_v39 = vmul.f32 %v1182_v38, %v691_v34  ;;  %v697_v40 = vmul.f32 %v1180_v33, %v696_v37  ;;  %vm709_vm6 = vweird.f32 %v1182_v38 }
 0x1f6   : > { %vm710_vm8 = vmor %vm708_vm7, %vm709_vm6 }
 0x1f7   : > { %v704_v41 = vmul.f32 %v1182_v38, %v703_v39  ;;  %v701_v43 = vsel %vm700_vm5, %v1180_v33, %v697_v40 }
 0x1f8   : > { %v712_v44 = vmul.f32 %v701_v43, %v674_v12  ;;  %v713_v45 = vmul.f32 %v701_v43, %v675_v14 }
 0x1f9   : > { %v705_v46 = vmul.f32 0.5, %v704_v41 }
 0x1fa   : > { %v728_v48 = vmul.f32 %v721_v42, %v712_v44  ;;  %v729_v49 = vmul.f32 %v721_v42, %v713_v45 }
 0x1fb   : > { %v706_v50 = vsub.f32 1.5, %v705_v46 }
 0x1fc   : > { %v744_v53 = vadd.f32 %v737_v47, %v728_v48  ;;  %v745_v52 = vadd.f32 %v737_v47, %v729_v49 }
 0x1fd   : > { %v707_v54 = vmul.f32 %v1182_v38, %v706_v50 }
 0x1fe   : > { %v748_v51 = vmax.f32 %v744_v53, 0.0  ;;  %v749_v55 = vmax.f32 %v745_v52, 0.0 }
 0x1ff   : > { %v711_v56 = vsel %vm710_vm8, %v1182_v38, %v707_v54 }
 0x200   : > { %v714_v57 = vmul.f32 %v711_v56, %v676_v21  ;;  %v715_v58 = vmul.f32 %v711_v56, %v677_v22  ;;  %752 = vst [vmem:[%s217_s5] sm:$0xff] %v748_v51 }
 0x201   : > { %753 = vst [vmem:[%s217_s5 + $0x8] sm:$0xff] %v749_v55  ;;  %v742_v60 = vpop.permute.xlu1 %741 }
 0x202   : > { %v730_v61 = vmul.f32 %v726_v59, %v714_v57  ;;  %v731_v62 = vmul.f32 %v726_v59, %v715_v58 }
 0x204   : > { %v746_v63 = vadd.f32 %v742_v60, %v730_v61  ;;  %v747_v0 = vadd.f32 %v742_v60, %v731_v62 }
 0x206   : > { %v750_v1 = vmax.f32 %v746_v63, 0.0  ;;  %v751_v2 = vmax.f32 %v747_v0, 0.0 }
 0x208   : > { %754 = vst [vmem:[%s217_s5 + $0x10] sm:$0xff] %v750_v1 }
 0x209   : > { %755 = vst [vmem:[%s217_s5 + $0x18] sm:$0xff] %v751_v2 }
 0x20a   : > { %1240 = shalt.err (!%p1237_p7)
}
 0x20b   : > { %s1285_s6 = smov 256   ;;  %s1286_s22 = smov 16  }
 0x20c   : > { %1124 = dma.vmem_to_hbm [thread:$0]  (%p1358_p11), %s770_s19, 512, %s772_s10, %s757_s25, %s1285_s6, %s1285_s6, %s1286_s22  }
 0x20d PF: > { %s786_s23 = sand.u32 1, %s1267_s15   ;;  %p1131_p8 = pnand %p847_p9, %p1362_p12 }
 0x20e   : > { %s787_s29 = scalar_lea.sflag [#allocation4], %s786_s23 }
 0x20f   : > { %p1132_p10 = pneg %p1131_p8 }
 0x211   : > { %1262 = dma.done.wait (%p1132_p10), %s787_s29, 512  }
 0x212   : > { %1264 = vsyncadd (%p1132_p10), %s787_s29, 4294966784  ;;  %p17_p0 = scmp.ge.s32.totalorder %s1337_s21, 4   ;;  %s1594_s15 = smov %s1271_s16 }
 0x213   : > { %s1595_s16 = smov %s1275_s17  ;;  %s1596_s17 = smov %s1349_s24 }
 0x214   : > { %s1597_s18 = smov %s1337_s21  ;;  %19 = sbr.rel (!%p17_p0) target bundleno = 5 (0x5), region = 81 }
 0x219   :  { %793 = vsyncpa [#allocation3], 1 }
 0x21a   :  { %795 = vsyncpa [#allocation3 + $0x1], 1 }
 0x21b   :  { %796 = vsyncpa [#allocation4], 1 }
 0x21c   :  { %798 = vsyncpa [#allocation4 + $0x1], 1 }

</bundles_post_ra>
